<compile_context>
chip_gen: v6e
topology: v6e:2x2x1
jax: 0.10.0
libtpu: 0.0.40
codegen_flags: <defaults>
</compile_context>

<pallas_src>
import functools

import jax
import jax.numpy as jnp
from jax.experimental import pallas as pl
from jax.experimental.pallas import tpu as pltpu

HIDDEN = 64       # logical hidden width (matches the PyTorch module)
HIDDEN_PAD = 128  # hidden width zero-padded to a full 128-lane vreg


def _round_up(n: int, m: int) -> int:
    return ((n + m - 1) // m) * m


def _pad2d(a, rows, cols):
    """Zero-pad a 2-D array up to (rows, cols)."""
    return jnp.pad(a, ((0, rows - a.shape[0]), (0, cols - a.shape[1])))


def _actor_kernel(x_ref, w1_ref, b1_ref, w2_ref, b2_ref, w3_ref, b3_ref, mu_ref):
    # bf16 MXU operands, f32 accumulation. Padded hidden cols are exactly zero
    # (zero weight cols / zero bias -> tanh(0) = 0) and contribute 0 downstream.
    x = x_ref[...].astype(jnp.bfloat16)
    h = jnp.tanh(
        jnp.dot(x, w1_ref[...], preferred_element_type=jnp.float32) + b1_ref[...]
    )
    h = jnp.tanh(
        jnp.dot(h.astype(jnp.bfloat16), w2_ref[...],
                preferred_element_type=jnp.float32) + b2_ref[...]
    )
    # TODO(synk): on v6e/v7x the tanh's could run in bf16 (2x EUP); kept f32 for v5e.
    mu_ref[...] = (
        jnp.dot(h.astype(jnp.bfloat16), w3_ref[...],
                preferred_element_type=jnp.float32) + b3_ref[...]
    )


@functools.partial(jax.jit, static_argnames=("tile_batch",))
def typical_actor_forward(x, params, *, tile_batch=4096):
    """x: (B, obs_dim) float32.  params: dict of (in,out) weights and (1,out) biases.

    Returns mu: (B, action_dim) float32.
    """
    x = x.astype(jnp.float32)
    B, obs_dim = x.shape
    action_dim = params["w3"].shape[1]

    # --- batch tile: >= 2 tiles when possible (v7x megacore), multiple of 8, VMEM cap
    tb = min(int(tile_batch), _round_up(pl.cdiv(B, 2), 8))
    tb = max(_round_up(tb, 8), 8)
    # double-buffered x + mu tiles (f32 in VMEM) + two (tb, HIDDEN_PAD) f32 temporaries
    per_row_bytes = 2 * obs_dim * 4 + 2 * action_dim * 4 + 2 * HIDDEN_PAD * 4
    vmem_budget = 16 * 1024 * 1024
    while tb > 8 and tb * per_row_bytes > vmem_budget:
        tb = max(_round_up(tb // 2, 8), 8)

    grid = (pl.cdiv(B, tb),)  # ragged last tile: rows independent, writes masked

    # --- weights: (in, out), zero-padded on the hidden dim only, bf16 MXU operands
    w1 = _pad2d(params["w1"], obs_dim, HIDDEN_PAD).astype(jnp.bfloat16)
    b1 = _pad2d(params["b1"].astype(jnp.float32), 1, HIDDEN_PAD)
    w2 = _pad2d(params["w2"], HIDDEN_PAD, HIDDEN_PAD).astype(jnp.bfloat16)
    b2 = _pad2d(params["b2"].astype(jnp.float32), 1, HIDDEN_PAD)
    w3 = _pad2d(params["w3"], HIDDEN_PAD, action_dim).astype(jnp.bfloat16)
    b3 = params["b3"].astype(jnp.float32)

    const = lambda shape: pl.BlockSpec(shape, lambda i: (0, 0))

    flops = 2 * B * (obs_dim * HIDDEN + HIDDEN * HIDDEN + HIDDEN * action_dim)
    bytes_accessed = (
        B * obs_dim * 4 + B * action_dim * 4
        + (w1.size + w2.size + w3.size) * 2
        + (b1.size + b2.size + b3.size) * 4
    )
    cost = pl.CostEstimate(
        flops=flops, transcendentals=2 * B * HIDDEN, bytes_accessed=bytes_accessed
    )

    mu = pl.pallas_call(
        _actor_kernel,
        out_shape=jax.ShapeDtypeStruct((B, action_dim), jnp.float32),
        grid_spec=pltpu.PrefetchScalarGridSpec(
            num_scalar_prefetch=0,
            grid=grid,
            in_specs=[
                pl.BlockSpec((tb, obs_dim), lambda i: (i, 0)),  # x: unpadded, batch-tiled
                const((obs_dim, HIDDEN_PAD)),                    # w1: VMEM-resident
                const((1, HIDDEN_PAD)),                          # b1
                const((HIDDEN_PAD, HIDDEN_PAD)),                 # w2
                const((1, HIDDEN_PAD)),                          # b2
                const((HIDDEN_PAD, action_dim)),                 # w3 (narrow out cols)
                const((1, action_dim)),                          # b3
            ],
            # narrow mu writeback: masked vst but 32x less HBM write, no wrapper slice
            out_specs=pl.BlockSpec((tb, action_dim), lambda i: (i, 0)),
        ),
        compiler_params=pltpu.CompilerParams(
            dimension_semantics=("parallel",),  # megacore split on v7x
            vmem_limit_bytes=32 << 20,          # headroom on v7x (64 MiB physical/TC)
        ),
        cost_estimate=cost,
    )(x, w1, b1, w2, b2, w3, b3)

    return mu


def init_params(key, observation_dim, action_dim):
    """Deterministic PyTorch-Linear-style init (uniform(-1/sqrt(fan_in), 1/sqrt(fan_in)))."""
    ks = jax.random.split(key, 6)

    def linear(kw, kb, fan_in, fan_out):
        bound = 1.0 / jnp.sqrt(jnp.asarray(fan_in, jnp.float32))
        w = jax.random.uniform(kw, (fan_in, fan_out), jnp.float32, -bound, bound)
        b = jax.random.uniform(kb, (1, fan_out), jnp.float32, -bound, bound)
        return w, b

    w1, b1 = linear(ks[0], ks[1], observation_dim, HIDDEN)
    w2, b2 = linear(ks[2], ks[3], HIDDEN, HIDDEN)
    w3, b3 = linear(ks[4], ks[5], HIDDEN, action_dim)
    return {"w1": w1, "b1": b1, "w2": w2, "b2": b2, "w3": w3, "b3": b3}


def reference_forward(x, params, operand_dtype=jnp.float32):
    """Pure-JAX reference. operand_dtype=bf16 emulates the kernel's MXU precision."""
    c = lambda a: a.astype(operand_dtype).astype(jnp.float32)
    h = jnp.tanh(c(x) @ c(params["w1"]) + params["b1"].astype(jnp.float32))
    h = jnp.tanh(c(h) @ c(params["w2"]) + params["b2"].astype(jnp.float32))
    return c(h) @ c(params["w3"]) + params["b3"].astype(jnp.float32)


if __name__ == "__main__":
    key = jax.random.PRNGKey(0)
    k_param, k_x, k_x2 = jax.random.split(key, 3)

    batch = 8
    observation_dim = 32
    action_dim = 4

    params = init_params(k_param, observation_dim, action_dim)

    # small test (single tile)
    x = jax.random.normal(k_x, (batch, observation_dim), jnp.float32)
    mu = jax.block_until_ready(typical_actor_forward(x, params))
    assert mu.shape == (batch, action_dim)
    # tight check vs bf16-operand reference (same precision as the kernel)
    ref_bf16 = reference_forward(x, params, operand_dtype=jnp.bfloat16)
    assert jnp.allclose(mu, ref_bf16, atol=1e-4, rtol=1e-4)
    # loose check vs f32 reference (documents bf16-matmul drift)
    ref_f32 = reference_forward(x, params)
    assert jnp.allclose(mu, ref_f32, atol=2e-2, rtol=2e-2)

    # larger, non-multiple-of-tile batch: exercises >1 tile, the parallel axis,
    # and the ragged (masked) last tile
    x_big = jax.random.normal(k_x2, (2051, observation_dim), jnp.float32)
    mu_big = jax.block_until_ready(typical_actor_forward(x_big, params))
    assert mu_big.shape == (2051, action_dim)
    ref_big_bf16 = reference_forward(x_big, params, operand_dtype=jnp.bfloat16)
    assert jnp.allclose(mu_big, ref_big_bf16, atol=1e-4, rtol=1e-4)
    ref_big_f32 = reference_forward(x_big, params)
    assert jnp.allclose(mu_big, ref_big_f32, atol=2e-2, rtol=2e-2)

    print("KERNEL_OK")
</pallas_src>

<mosaic_0001>
module attributes {stable_mosaic.version = 11 : i64} {
  func.func @_actor_kernel(%arg0: i32, %arg1: memref<8x32xf32, #tpu.memory_space<vmem>>, %arg2: memref<32x128xbf16, #tpu.memory_space<vmem>>, %arg3: memref<1x128xf32, #tpu.memory_space<vmem>>, %arg4: memref<128x128xbf16, #tpu.memory_space<vmem>>, %arg5: memref<1x128xf32, #tpu.memory_space<vmem>>, %arg6: memref<128x4xbf16, #tpu.memory_space<vmem>>, %arg7: memref<1x4xf32, #tpu.memory_space<vmem>>, %arg8: memref<8x4xf32, #tpu.memory_space<vmem>>) attributes {dimension_semantics = [#tpu.dimension_semantics<parallel>], iteration_bounds = array<i64: 1>, scalar_prefetch = 0 : i64, scratch_operands = 0 : i64, tpu.core_type = #tpu.core_type<tc>, window_params = [{transform_indices = @transform_0, window_bounds = array<i64: 8, 32>}, {pipeline_mode = #tpu.pipeline_mode<synchronous>, transform_indices = @transform_1, window_bounds = array<i64: 32, 128>}, {pipeline_mode = #tpu.pipeline_mode<synchronous>, transform_indices = @transform_2, window_bounds = array<i64: 1, 128>}, {pipeline_mode = #tpu.pipeline_mode<synchronous>, transform_indices = @transform_3, window_bounds = array<i64: 128, 128>}, {pipeline_mode = #tpu.pipeline_mode<synchronous>, transform_indices = @transform_4, window_bounds = array<i64: 1, 128>}, {pipeline_mode = #tpu.pipeline_mode<synchronous>, transform_indices = @transform_5, window_bounds = array<i64: 128, 4>}, {pipeline_mode = #tpu.pipeline_mode<synchronous>, transform_indices = @transform_6, window_bounds = array<i64: 1, 4>}, {transform_indices = @transform_7, window_bounds = array<i64: 8, 4>}]} {
    %c0 = arith.constant 0 : index
    %c0_0 = arith.constant 0 : index
    %0 = vector.load %arg1[%c0, %c0_0] : memref<8x32xf32, #tpu.memory_space<vmem>>, vector<8x32xf32>
    %1 = arith.truncf %0 : vector<8x32xf32> to vector<8x32xbf16>
    %c0_1 = arith.constant 0 : index
    %c0_2 = arith.constant 0 : index
    %2 = vector.load %arg2[%c0_1, %c0_2] : memref<32x128xbf16, #tpu.memory_space<vmem>>, vector<32x128xbf16>
    %cst = arith.constant dense<0.000000e+00> : vector<8x128xf32>
    %3 = tpu.matmul %1, %2, %cst {dimension_numbers = #tpu.dot_dimension_numbers<[1], [0], [0], [1], [0, 0, 1, 1], [], []>} : vector<8x32xbf16>, vector<32x128xbf16>, vector<8x128xf32> -> vector<8x128xf32>
    %c0_3 = arith.constant 0 : index
    %c0_4 = arith.constant 0 : index
    %4 = vector.load %arg3[%c0_3, %c0_4] : memref<1x128xf32, #tpu.memory_space<vmem>>, vector<1x128xf32>
    %5 = vector.broadcast %4 : vector<1x128xf32> to vector<8x128xf32>
    %6 = arith.addf %3, %5 : vector<8x128xf32>
    %7 = math.tanh %6 : vector<8x128xf32>
    %8 = arith.truncf %7 : vector<8x128xf32> to vector<8x128xbf16>
    %c0_5 = arith.constant 0 : index
    %c0_6 = arith.constant 0 : index
    %9 = vector.load %arg4[%c0_5, %c0_6] : memref<128x128xbf16, #tpu.memory_space<vmem>>, vector<128x128xbf16>
    %cst_7 = arith.constant dense<0.000000e+00> : vector<8x128xf32>
    %10 = tpu.matmul %8, %9, %cst_7 {dimension_numbers = #tpu.dot_dimension_numbers<[1], [0], [0], [1], [0, 0, 1, 1], [], []>} : vector<8x128xbf16>, vector<128x128xbf16>, vector<8x128xf32> -> vector<8x128xf32>
    %c0_8 = arith.constant 0 : index
    %c0_9 = arith.constant 0 : index
    %11 = vector.load %arg5[%c0_8, %c0_9] : memref<1x128xf32, #tpu.memory_space<vmem>>, vector<1x128xf32>
    %12 = vector.broadcast %11 : vector<1x128xf32> to vector<8x128xf32>
    %13 = arith.addf %10, %12 : vector<8x128xf32>
    %14 = math.tanh %13 : vector<8x128xf32>
    %15 = arith.truncf %14 : vector<8x128xf32> to vector<8x128xbf16>
    %c0_10 = arith.constant 0 : index
    %c0_11 = arith.constant 0 : index
    %16 = vector.load %arg6[%c0_10, %c0_11] : memref<128x4xbf16, #tpu.memory_space<vmem>>, vector<128x4xbf16>
    %cst_12 = arith.constant dense<0.000000e+00> : vector<8x4xf32>
    %17 = tpu.matmul %15, %16, %cst_12 {dimension_numbers = #tpu.dot_dimension_numbers<[1], [0], [0], [1], [0, 0, 1, 1], [], []>} : vector<8x128xbf16>, vector<128x4xbf16>, vector<8x4xf32> -> vector<8x4xf32>
    %c0_13 = arith.constant 0 : index
    %c0_14 = arith.constant 0 : index
    %18 = vector.load %arg7[%c0_13, %c0_14] : memref<1x4xf32, #tpu.memory_space<vmem>>, vector<1x4xf32>
    %19 = vector.broadcast %18 : vector<1x4xf32> to vector<8x4xf32>
    %20 = arith.addf %17, %19 : vector<8x4xf32>
    %c0_15 = arith.constant 0 : index
    %c0_16 = arith.constant 0 : index
    %21 = vector.load %arg8[%c0_15, %c0_16] : memref<8x4xf32, #tpu.memory_space<vmem>>, vector<8x4xf32>
    tpu.vector_store %arg8[%c0_15, %c0_16], %20 {strides = array<i32>} : memref<8x4xf32, #tpu.memory_space<vmem>>, vector<8x4xf32>,
    return
  }
  func.func @transform_0(%arg0: i32) -> (i32, i32) {
    %c0_i32 = arith.constant 0 : i32
    %c0_i32_0 = arith.constant 0 : i32
    return %arg0, %c0_i32 : i32, i32
  }
  func.func @transform_1(%arg0: i32) -> (i32, i32) {
    %c0_i32 = arith.constant 0 : i32
    %c0_i32_0 = arith.constant 0 : i32
    %c0_i32_1 = arith.constant 0 : i32
    return %c0_i32, %c0_i32_0 : i32, i32
  }
  func.func @transform_2(%arg0: i32) -> (i32, i32) {
    %c0_i32 = arith.constant 0 : i32
    %c0_i32_0 = arith.constant 0 : i32
    %c0_i32_1 = arith.constant 0 : i32
    return %c0_i32, %c0_i32_0 : i32, i32
  }
  func.func @transform_3(%arg0: i32) -> (i32, i32) {
    %c0_i32 = arith.constant 0 : i32
    %c0_i32_0 = arith.constant 0 : i32
    %c0_i32_1 = arith.constant 0 : i32
    return %c0_i32, %c0_i32_0 : i32, i32
  }
  func.func @transform_4(%arg0: i32) -> (i32, i32) {
    %c0_i32 = arith.constant 0 : i32
    %c0_i32_0 = arith.constant 0 : i32
    %c0_i32_1 = arith.constant 0 : i32
    return %c0_i32, %c0_i32_0 : i32, i32
  }
  func.func @transform_5(%arg0: i32) -> (i32, i32) {
    %c0_i32 = arith.constant 0 : i32
    %c0_i32_0 = arith.constant 0 : i32
    %c0_i32_1 = arith.constant 0 : i32
    return %c0_i32, %c0_i32_0 : i32, i32
  }
  func.func @transform_6(%arg0: i32) -> (i32, i32) {
    %c0_i32 = arith.constant 0 : i32
    %c0_i32_0 = arith.constant 0 : i32
    %c0_i32_1 = arith.constant 0 : i32
    return %c0_i32, %c0_i32_0 : i32, i32
  }
  func.func @transform_7(%arg0: i32) -> (i32, i32) {
    %c0_i32 = arith.constant 0 : i32
    %c0_i32_0 = arith.constant 0 : i32
    return %arg0, %c0_i32 : i32, i32
  }
}

</mosaic_0001>

<bundles_post_ra>
// kernel: typical_actor_forward.1
= control target key start
LH: loop header
LB: loop body
LE: loop exit
PB: predicated region body
PF: predicated region fallthrough
CT: control target
= control target key end

     0   :  { %v443_v0 = vmov 0.0   ;;  %vm444_vm0 = vmmov 0   ;;  %vm52_vm1 = vcmask 261120   ;;  %vm322_vm2 = vcmask 31744   ;;  %s578_s1 = inlined_call_operand.vmem [shape: bf16[32,128], index: 1, kind: input, shape index: {}]   ;;  %s579_s0 = inlined_call_operand.vmem [shape: f32[8,32], index: 0, kind: input, shape index: {}]   ;;  %s580_s3 = inlined_call_operand.vmem [shape: bf16[128,128], index: 3, kind: input, shape index: {}]   ;;  %s581_s5 = inlined_call_operand.vmem [shape: bf16[128,4], index: 5, kind: input, shape index: {}]   ;;  %s582_s2 = inlined_call_operand.vmem [shape: f32[1,128], index: 2, kind: input, shape index: {}]   ;;  %s583_s4 = inlined_call_operand.vmem [shape: f32[1,128], index: 4, kind: input, shape index: {}]   ;;  %s584_s6 = inlined_call_operand.vmem [shape: f32[1,4], index: 6, kind: input, shape index: {}]   ;;  %s585_s7 = inlined_call_operand.vmem [shape: f32[8,4], index: 7, kind: output, shape index: {}]  }
   0x1   :  { %371 = vmatprep.subr.bf16.mxu0 %v443_v0  ;;  %v421_v1 = vld [vmem:[%s578_s1 + $0x8] sm:$0xff]   ;;  %375 = vmatprep.mubr.msk.bf16.mxu0 %vm444_vm0, %v443_v0  ;;  %v422_v2 = vld [vmem:[%s578_s1] sm:$0xff]   ;;  %v423_v4 = vld [vmem:[%s580_s3 + $0x38] sm:$0xff]  }
   0x2   :  { %379 = vmatprep.subr.bf16.mxu1 %v443_v0  ;;  %395 = vmatprep.mubr.msk.bf16.mxu1 %vm444_vm0, %v443_v0  ;;  %v27_v3 = vld [vmem:[%s579_s0] sm:$0xff]  ;;  %v424_v6 = vld [vmem:[%s580_s3 + $0x30] sm:$0xff]   ;;  %v425_v7 = vld [vmem:[%s580_s3 + $0x28] sm:$0xff]  }
   0x3   :  { %372 = vmatpush3.bf16.msra.mxu0 %v421_v1  ;;  %v28_v5 = vpack.c.bf16 %v27_v3, %v27_v3  ;;  %380 = vmatpush3.bf16.msra.mxu1 %v423_v4  ;;  %v426_v8 = vld [vmem:[%s580_s3 + $0x20] sm:$0xff]   ;;  %v427_v9 = vld [vmem:[%s580_s3 + $0x18] sm:$0xff]   ;;  %v428_v10 = vld [vmem:[%s580_s3 + $0x10] sm:$0xff]  }
   0x4   :  { %373 = vmatprep.subr.bf16.mxu0 %v443_v0  ;;  %381 = vmatprep.subr.bf16.mxu1 %v443_v0  ;;  %v429_v11 = vld [vmem:[%s580_s3 + $0x8] sm:$0xff]   ;;  %v430_v12 = vld [vmem:[%s580_s3] sm:$0xff]   ;;  %v431_v13 = vld [vmem:[%s581_s5 + $0x38] sm:$0xff]  }
   0x5   :  { %v432_v14 = vld [vmem:[%s581_s5 + $0x30] sm:$0xff]   ;;  %v433_v15 = vld [vmem:[%s581_s5 + $0x28] sm:$0xff]   ;;  %v328_v16 = vld [vmem:[%s582_s2] ss:$0 sm:$0xff] }
   0x6   :  { %v434_v24 = vld [vmem:[%s581_s5 + $0x20] sm:$0xff]   ;;  %v435_v25 = vld [vmem:[%s581_s5 + $0x18] sm:$0xff]   ;;  %v436_v26 = vld [vmem:[%s581_s5 + $0x10] sm:$0xff]  }
   0x7   :  { %374 = vmatpush3.bf16.msra.mxu0 %v422_v2  ;;  %382 = vmatpush3.bf16.msra.mxu1 %v424_v6  ;;  %v437_v27 = vld [vmem:[%s581_s5 + $0x8] sm:$0xff]   ;;  %v438_v28 = vld [vmem:[%s581_s5] sm:$0xff]  }
   0x8   :  { %399 = vmatprep.subr.bf16.mxu0 %v443_v0  ;;  %383 = vmatprep.subr.bf16.mxu1 %v443_v0  ;;  %v332_v29 = vld [vmem:[%s583_s4] ss:$0 sm:$0xff] }
   0x9   :  { %v341_v37 = vld [vmem:[%s584_s6] ss:$0 sm:$0xff] }
   0xa   :  { %376 = vmatmul.mubr.msk.bf16.vlgmr.msra.gmra.mxu0 %vm52_vm1, %v28_v5 }
   0xb   :  { %415 = vmatprep.mubr.msk.bf16.mxu0 %vm444_vm0, %v443_v0  ;;  %384 = vmatpush3.bf16.msra.mxu1 %v425_v7 }
   0xc   :  { %385 = vmatprep.subr.bf16.mxu1 %v443_v0  ;;  %400 = vmatpush3.bf16.msra.mxu0 %v431_v13 }
   0xd   :  { %401 = vmatprep.subr.bf16.mxu0 %v443_v0 }
   0xf   :  { %386 = vmatpush3.bf16.msra.mxu1 %v426_v8 }
  0x10   :  { %387 = vmatprep.subr.bf16.mxu1 %v443_v0  ;;  %402 = vmatpush3.bf16.msra.mxu0 %v432_v14 }
  0x11   :  { %403 = vmatprep.subr.bf16.mxu0 %v443_v0 }
  0x13   :  { %388 = vmatpush3.bf16.msra.mxu1 %v427_v9 }
  0x14   :  { %389 = vmatprep.subr.bf16.mxu1 %v443_v0  ;;  %404 = vmatpush3.bf16.msra.mxu0 %v433_v15 }
  0x15   :  { %405 = vmatprep.subr.bf16.mxu0 %v443_v0 }
  0x17   :  { %390 = vmatpush3.bf16.msra.mxu1 %v428_v10 }
  0x18   :  { %391 = vmatprep.subr.bf16.mxu1 %v443_v0  ;;  %406 = vmatpush3.bf16.msra.mxu0 %v434_v24 }
  0x19   :  { %407 = vmatprep.subr.bf16.mxu0 %v443_v0 }
  0x1b   :  { %392 = vmatpush3.bf16.msra.mxu1 %v429_v11 }
  0x1c   :  { %393 = vmatprep.subr.bf16.mxu1 %v443_v0  ;;  %408 = vmatpush3.bf16.msra.mxu0 %v435_v25 }
  0x1d   :  { %409 = vmatprep.subr.bf16.mxu0 %v443_v0 }
  0x1f   :  { %394 = vmatpush3.bf16.msra.mxu1 %v430_v12 }
  0x20   :  { %410 = vmatpush3.bf16.msra.mxu0 %v436_v26 }
  0x21   :  { %411 = vmatprep.subr.bf16.mxu0 %v443_v0 }
  0x24   :  { %412 = vmatpush3.bf16.msra.mxu0 %v437_v27 }
  0x25   :  { %413 = vmatprep.subr.bf16.mxu0 %v443_v0 }
  0x28   :  { %414 = vmatpush3.bf16.msra.mxu0 %v438_v28 }
  0xca   :  { %v90_v17 = vpop.f32.mrf.mxu0 }
  0xcb   :  { %v91_v18 = vadd.f32 %v328_v16, %v90_v17 }
  0xcc   :  { %v377_v19 = vpop.f32.mrf.mxu0 }
  0xcd   :  { %439 = vtanh.f32 %v91_v18 }
  0xce   :  { %v93_v20 = vpop.f32.mrf.mxu0 }
  0xd0   :  { %v378_v21 = vpop.f32.mrf.mxu0 }
  0xda   :  { %v440_v22 = vpop.eup %439 }
  0xdb   :  { %v97_v23 = vpack.c.bf16 %v440_v22, %v440_v22 }
  0xdd   :  { %396 = vmatmul.mubr.bf16.vlgmr.msra.gmra.mxu1 %v97_v23 }
 0x19d   :  { %v203_v30 = vpop.f32.mrf.mxu1 }
 0x19e   :  { %v204_v31 = vadd.f32 %v332_v29, %v203_v30 }
 0x19f   :  { %v397_v32 = vpop.f32.mrf.mxu1 }
 0x1a0   :  { %441 = vtanh.f32 %v204_v31 }
 0x1a1   :  { %v206_v33 = vpop.f32.mrf.mxu1 }
 0x1a3   :  { %v398_v34 = vpop.f32.mrf.mxu1 }
 0x1ad   :  { %v442_v35 = vpop.eup %441 }
 0x1ae   :  { %v210_v36 = vpack.c.bf16 %v442_v35, %v442_v35 }
 0x1b0   :  { %416 = vmatmul.mubr.bf16.vlgmr.msra.gmra.mxu0 %v210_v36 }
 0x270   :  { %v316_v38 = vpop.f32.mrf.mxu0 }
 0x271   :  { %v317_v39 = vadd.f32 %v341_v37, %v316_v38 }
 0x272   :  { %v417_v40 = vpop.f32.mrf.mxu0 }
 0x273   :  { %323 = vst.msk [vmem:[%s585_s7] sm:$0xff] %vm322_vm2, %v317_v39 }
 0x274   :  { %v319_v41 = vpop.f32.mrf.mxu0 }
 0x276   :  { %v418_v42 = vpop.f32.mrf.mxu0 }

</bundles_post_ra>
